<compile_context>
chip_gen: v6e
topology: v6e:2x2x1
jax: 0.10.0
libtpu: 0.0.40
codegen_flags: <defaults>
</compile_context>

<pallas_src>
import numpy as np

import jax
import jax.numpy as jnp
from jax.experimental import pallas as pl
from jax.experimental.pallas import tpu as pltpu


# --------------------------------------------------------------------------
# Generation-aware VMEM budgets
# --------------------------------------------------------------------------

def _tpu_vmem_capacity_bytes():
    try:
        info = pltpu.get_tpu_info()
        cap = getattr(info, "vmem_capacity_bytes", None)
        if cap:
            return int(cap)
    except Exception:
        pass
    return 64 * 1024 * 1024          # v7x-safe fallback


_VMEM_CAP = _tpu_vmem_capacity_bytes()
_VMEM_LIMIT_BYTES = min(int(_VMEM_CAP * 3 // 4), 100 * 1024 * 1024)
# Single-copy per-step byte budgets; BlockSpec double-buffers every operand,
# so resident VMEM is ~2x these + in-kernel f32 intermediates.
_LINEAR_STEP_BUDGET = _VMEM_LIMIT_BYTES // 4
_ATTN_STEP_BUDGET = _VMEM_LIMIT_BYTES // 6


# --------------------------------------------------------------------------
# In-kernel helpers
# --------------------------------------------------------------------------

def _gelu_tanh(x):
    # tanh-approx GELU: transcendental work goes to the EUP slot.
    # TODO(synk): exact-erf parity with torch.nn.GELU differs by ~1e-3 rel.;
    # switch to lax.erf if exact parity is required and it lowers in Mosaic.
    c = 0.7978845608028654  # sqrt(2/pi)
    return 0.5 * x * (1.0 + jnp.tanh(c * (x + 0.044715 * x * x * x)))


def _make_fused_linear_kernel(has_ln_in, has_ln_out, has_res, gelu, eps):
    """x -> [LN] -> x @ W + b -> [GELU] -> [LN] -> [+residual]."""

    def kernel(*refs):
        it = iter(refs)
        x_ref = next(it)
        w_ref = next(it)
        b_ref = next(it)
        gi_ref = bi_ref = go_ref = bo_ref = r_ref = None
        if has_ln_in:
            gi_ref = next(it)
            bi_ref = next(it)
        if has_ln_out:
            go_ref = next(it)
            bo_ref = next(it)
        if has_res:
            r_ref = next(it)
        o_ref = next(it)

        x = x_ref[...]
        if has_ln_in:
            x = x.astype(jnp.float32)
            mu = jnp.mean(x, axis=-1, keepdims=True)
            xc = x - mu
            var = jnp.mean(xc * xc, axis=-1, keepdims=True)
            x = xc * jax.lax.rsqrt(var + eps) * gi_ref[...] + bi_ref[...]

        # bf16 MXU operands, f32 accumulation; elementwise math stays f32.
        acc = jnp.dot(x.astype(jnp.bfloat16), w_ref[...].astype(jnp.bfloat16),
                      preferred_element_type=jnp.float32)
        acc = acc + b_ref[...].astype(jnp.float32)

        if gelu:
            acc = _gelu_tanh(acc)

        if has_ln_out:
            mu = jnp.mean(acc, axis=-1, keepdims=True)
            ac = acc - mu
            var = jnp.mean(ac * ac, axis=-1, keepdims=True)
            acc = ac * jax.lax.rsqrt(var + eps) * go_ref[...] + bo_ref[...]

        if has_res:
            acc = acc + r_ref[...].astype(jnp.float32)

        o_ref[...] = acc.astype(o_ref.dtype)

    return kernel


def _make_window_attn_kernel(num_heads, head_dim, masked):
    C = num_heads * head_dim

    def kernel(qkv_ref, bias_ref, *rest):
        if masked:
            mask_ref, o_ref = rest
            mask = mask_ref[...]                      # (Wb, N, N) f32
        else:
            (o_ref,) = rest
            mask = None

        qkv = qkv_ref[...]                            # (Wb, N, 3C) bf16
        bias = bias_ref[...]                          # (nH, N, N) f32

        outs = []
        for h in range(num_heads):                    # unrolled at trace time
            lo, hi = h * head_dim, (h + 1) * head_dim
            qh = qkv[:, :, lo:hi].astype(jnp.bfloat16)        # scale pre-folded into W_qkv
            kh = qkv[:, :, C + lo:C + hi].astype(jnp.bfloat16)
            vh = qkv[:, :, 2 * C + lo:2 * C + hi].astype(jnp.bfloat16)

            s = jnp.einsum('wnd,wmd->wnm', qh, kh,
                           preferred_element_type=jnp.float32)
            s = s + bias[h]                           # (N, N) broadcast over windows
            if masked:
                s = s + mask
            s = s - jnp.max(s, axis=-1, keepdims=True)
            p = jnp.exp(s)
            denom = jnp.sum(p, axis=-1, keepdims=True)          # (Wb, N, 1)
            pv = jnp.einsum('wnm,wmd->wnd', p.astype(jnp.bfloat16), vh,
                            preferred_element_type=jnp.float32)
            # 1/denom applied to the smaller (Wb,N,D) tensor, not (Wb,N,N).
            outs.append(pv * pl.reciprocal(denom, approx=True))

        out = outs[0] if num_heads == 1 else jnp.concatenate(outs, axis=-1)
        o_ref[...] = out.astype(o_ref.dtype)          # lane-dense (Wb, N, C)

    return kernel


# --------------------------------------------------------------------------
# pallas_call wrappers
# --------------------------------------------------------------------------

def pallas_fused_linear(x, w, b=None, *, ln_in=None, ln_out=None, gelu=False,
                        residual=None, eps=1e-5, out_dtype=None):
    """Fused [LN] -> (x @ w + b) -> [GELU] -> [LN] -> [+residual].

    x: (M, K), w: (K, N), b: (N,) or None, residual: (M, N) or None.
    ln_in / ln_out: (gamma, beta) over K / N respectively, or None.
    """
    M, K = x.shape
    N = w.shape[1]
    if out_dtype is None:
        out_dtype = x.dtype
    if b is None:
        b = jnp.zeros((N,), jnp.float32)

    has_ln_in = ln_in is not None
    has_ln_out = ln_out is not None
    has_res = residual is not None

    xb = jnp.dtype(x.dtype).itemsize
    wbytes = jnp.dtype(w.dtype).itemsize
    ob = jnp.dtype(out_dtype).itemsize
    rbytes = jnp.dtype(residual.dtype).itemsize if has_res else 0

    def step_bytes(tm_, tn_):
        s = tm_ * K * xb + K * tn_ * wbytes + tm_ * tn_ * ob + tn_ * 4
        s += tm_ * tn_ * 4                # f32 accumulator
        if has_res:
            s += tm_ * tn_ * rbytes
        if has_ln_in:
            s += 2 * K * 4 + tm_ * K * 4  # gamma/beta + f32 normalized x
        if has_ln_out:
            s += 2 * tn_ * 4
        return s

    # ln_out needs full N for correctness; ln_in keeps full N so the LN of the
    # x tile is never recomputed across N tiles -> shrink tm only in that case.
    keep_full_n = has_ln_in or has_ln_out
    tm, tn = M, N
    while step_bytes(tm, tn) > _LINEAR_STEP_BUDGET and tm > 256:
        tm = max(256, (tm // 2) // 8 * 8)
    while (step_bytes(tm, tn) > _LINEAR_STEP_BUDGET and tn > 128
           and not keep_full_n):
        tn = max(128, (tn // 2) // 128 * 128)
    while step_bytes(tm, tn) > _LINEAR_STEP_BUDGET and tm > 8:
        tm = max(8, (tm // 2) // 8 * 8)
    # (If keep_full_n and the weight slab still exceeds the budget at tm=8 we
    #  proceed anyway; never triggered at Swin/Donut shapes.)

    gm, gn = pl.cdiv(M, tm), pl.cdiv(N, tn)

    # Streaming order: with N innermost the weight is re-streamed gm times,
    # with M innermost x is re-streamed gn times. Pick the cheaper one.
    w_total = K * N * wbytes
    x_total = M * K * xb
    m_inner = (gn * x_total + w_total) < (gm * w_total + x_total)

    if m_inner:
        grid = (gn, gm)

        def remap(f):
            return lambda j, i: f(i, j)
    else:
        grid = (gm, gn)

        def remap(f):
            return f

    in_specs = [
        pl.BlockSpec((tm, K), remap(lambda i, j: (i, 0))),
        pl.BlockSpec((K, tn), remap(lambda i, j: (0, j))),
        pl.BlockSpec((1, tn), remap(lambda i, j: (0, j))),
    ]
    inputs = [x, w, b.reshape(1, N)]

    if has_ln_in:
        g, bb = ln_in
        in_specs += [pl.BlockSpec((1, K), remap(lambda i, j: (0, 0))),
                     pl.BlockSpec((1, K), remap(lambda i, j: (0, 0)))]
        inputs += [g.reshape(1, K), bb.reshape(1, K)]
    if has_ln_out:
        g, bb = ln_out
        in_specs += [pl.BlockSpec((1, tn), remap(lambda i, j: (0, j))),
                     pl.BlockSpec((1, tn), remap(lambda i, j: (0, j)))]
        inputs += [g.reshape(1, N), bb.reshape(1, N)]
    if has_res:
        in_specs += [pl.BlockSpec((tm, tn), remap(lambda i, j: (i, j)))]
        inputs += [residual]

    kern = _make_fused_linear_kernel(has_ln_in, has_ln_out, has_res, gelu, eps)
    return pl.pallas_call(
        kern,
        out_shape=jax.ShapeDtypeStruct((M, N), out_dtype),
        grid_spec=pl.GridSpec(
            grid=grid,
            in_specs=in_specs,
            out_specs=pl.BlockSpec((tm, tn), remap(lambda i, j: (i, j))),
        ),
        compiler_params=pltpu.CompilerParams(
            dimension_semantics=("parallel", "parallel"),
            vmem_limit_bytes=_VMEM_LIMIT_BYTES,
        ),
    )(*inputs)


def _pick_window_block(base, B_, N, C, num_heads, masked, qkv_bytes, out_bytes):
    """Largest divisor of `base` that fits the budget, preferring >=2 grid steps."""

    def bytes_for(wb):
        b = wb * N * 3 * C * qkv_bytes + wb * N * C * out_bytes
        b += num_heads * N * N * 4
        b += 2 * wb * N * N * 4 + wb * N * C * 4   # f32 scores/probs + partial outs
        if masked:
            b += wb * N * N * 4
        return b

    divs = [d for d in range(base, 0, -1) if base % d == 0]
    fitting = [d for d in divs if bytes_for(d) <= _ATTN_STEP_BUDGET]
    if not fitting:
        return 1
    multi = [d for d in fitting if B_ // d >= 2]   # keep pipeline / both TCs busy
    return multi[0] if multi else fitting[0]


def pallas_window_attention(qkv, rel_bias, mask, num_heads, nW, out_dtype=None):
    """qkv: (B_, N, 3C) -> attention output (B_, N, C).

    rel_bias: (nH, N, N); mask: (nW, N, N) or None (shift == 0).
    The softmax scale is assumed pre-folded into the q columns of the qkv
    projection. Batches Wb windows per grid step; output is lane-dense in C.
    """
    B_, N, threeC = qkv.shape
    C = threeC // 3
    D = C // num_heads
    masked = mask is not None
    if out_dtype is None:
        out_dtype = qkv.dtype

    base = nW if masked else B_          # masked blocks must not cross images
    Wb = _pick_window_block(base, B_, N, C, num_heads, masked,
                            jnp.dtype(qkv.dtype).itemsize,
                            jnp.dtype(out_dtype).itemsize)
    grid = (B_ // Wb,)

    in_specs = [
        pl.BlockSpec((Wb, N, threeC), lambda g: (g, 0, 0)),
        pl.BlockSpec((num_heads, N, N), lambda g: (0, 0, 0)),
    ]
    inputs = [qkv, rel_bias]
    if masked:
        n_mask_blocks = nW // Wb
        in_specs.append(
            pl.BlockSpec((Wb, N, N), lambda g: (g % n_mask_blocks, 0, 0)))
        inputs.append(mask)

    kern = _make_window_attn_kernel(num_heads, D, masked)
    return pl.pallas_call(
        kern,
        out_shape=jax.ShapeDtypeStruct((B_, N, C), out_dtype),
        grid_spec=pl.GridSpec(
            grid=grid,
            in_specs=in_specs,
            out_specs=pl.BlockSpec((Wb, N, C), lambda g: (g, 0, 0)),
        ),
        compiler_params=pltpu.CompilerParams(
            dimension_semantics=("parallel",),
            vmem_limit_bytes=_VMEM_LIMIT_BYTES,
        ),
    )(*inputs)


# --------------------------------------------------------------------------
# Swin building blocks (reshapes / rolls in plain JAX, compute in Pallas)
# --------------------------------------------------------------------------
# TODO(synk): a gather-fused window partition (PrefetchScalarGridSpec +
# pl.Element row index_map on the qkv linear's x spec) would remove the XLA
# roll/partition/reverse HBM round trips per block.

def window_partition(x, ws):
    B, H, W, C = x.shape
    x = x.reshape(B, H // ws, ws, W // ws, ws, C)
    x = jnp.transpose(x, (0, 1, 3, 2, 4, 5))
    return x.reshape(-1, ws * ws, C)


def window_reverse(windows, ws, H, W, B):
    C = windows.shape[-1]
    x = windows.reshape(B, H // ws, W // ws, ws, ws, C)
    x = jnp.transpose(x, (0, 1, 3, 2, 4, 5))
    return x.reshape(B, H, W, C)


def _window_partition_np(x, ws):
    B, H, W, C = x.shape
    x = x.reshape(B, H // ws, ws, W // ws, ws, C)
    x = x.transpose(0, 1, 3, 2, 4, 5)
    return x.reshape(-1, ws, ws, C)


def make_attn_mask(H, W, ws, shift):
    """Swin-v1 shifted-window attention mask: (nW, N, N) or None."""
    if shift == 0:
        return None
    img_mask = np.zeros((1, H, W, 1), dtype=np.float32)
    cnt = 0
    for h in (slice(0, -ws), slice(-ws, -shift), slice(-shift, None)):
        for w in (slice(0, -ws), slice(-ws, -shift), slice(-shift, None)):
            img_mask[:, h, w, :] = cnt
            cnt += 1
    mw = _window_partition_np(img_mask, ws).reshape(-1, ws * ws)
    am = mw[:, None, :] - mw[:, :, None]
    am = np.where(am != 0, -100.0, 0.0).astype(np.float32)
    return jnp.asarray(am)


def make_rel_bias(table, ws, num_heads):
    """table: ((2*ws-1)^2, nH) -> per-head bias (nH, N, N)."""
    coords = np.stack(np.meshgrid(np.arange(ws), np.arange(ws), indexing='ij'))
    cf = coords.reshape(2, -1)
    rel = (cf[:, :, None] - cf[:, None, :]).transpose(1, 2, 0).astype(np.int64)
    rel[:, :, 0] += ws - 1
    rel[:, :, 1] += ws - 1
    rel[:, :, 0] *= 2 * ws - 1
    idx = rel.sum(-1).reshape(-1)
    bias = table[idx].reshape(ws * ws, ws * ws, num_heads)
    return jnp.transpose(bias, (2, 0, 1))


def patch_embed(x, p, patch_size):
    """x: (B, Cin, H, W) -> (B, L, C). Conv(k=4,s=4) as a fused matmul + LN epilogue."""
    B, Cin, H, W = x.shape
    Hp, Wp = H // patch_size, W // patch_size
    x = x.reshape(B, Cin, Hp, patch_size, Wp, patch_size)
    x = jnp.transpose(x, (0, 2, 4, 1, 3, 5)).reshape(
        B * Hp * Wp, Cin * patch_size * patch_size)
    x = pallas_fused_linear(x, p['proj_w'], p['proj_b'],
                            ln_out=(p['norm_g'], p['norm_b']),
                            out_dtype=jnp.float32)
    C = x.shape[-1]
    return x.reshape(B, Hp * Wp, C)


def swin_block(x, p, H, W, num_heads, ws, shift, attn_mask):
    B, L, C = x.shape
    shortcut = x

    # norm1 is per-token, so it commutes with roll / window partition;
    # fuse it as the prologue of the qkv projection instead.
    y = x.reshape(B, H, W, C)
    if shift > 0:
        y = jnp.roll(y, (-shift, -shift), axis=(1, 2))
    xw = window_partition(y, ws)                       # (B*nW, N, C)
    B_, N, _ = xw.shape
    nW = (H // ws) * (W // ws)

    # qkv stored as bf16 in HBM (it is cast to bf16 before the MXU anyway).
    qkv = pallas_fused_linear(xw.reshape(B_ * N, C), p['qkv_w'], p['qkv_b'],
                              ln_in=(p['norm1_g'], p['norm1_b']),
                              out_dtype=jnp.bfloat16)
    qkv = qkv.reshape(B_, N, 3 * C)

    attn_out = pallas_window_attention(qkv, p['rel_bias'], attn_mask,
                                       num_heads, nW,
                                       out_dtype=jnp.bfloat16)   # (B_, N, C)

    xw = pallas_fused_linear(attn_out.reshape(B_ * N, C),
                             p['proj_w'], p['proj_b'],
                             out_dtype=jnp.float32).reshape(B_, N, C)

    y = window_reverse(xw, ws, H, W, B)
    if shift > 0:
        y = jnp.roll(y, (shift, shift), axis=(1, 2))
    x = shortcut + y.reshape(B, L, C)                  # residual stream stays f32

    # MLP: fused LN(norm2)+fc1+GELU (bf16 intermediate), fc2 with fused residual.
    x2d = x.reshape(B * L, C)
    z = pallas_fused_linear(x2d, p['fc1_w'], p['fc1_b'],
                            ln_in=(p['norm2_g'], p['norm2_b']), gelu=True,
                            out_dtype=jnp.bfloat16)
    x2d = pallas_fused_linear(z, p['fc2_w'], p['fc2_b'], residual=x2d,
                              out_dtype=jnp.float32)
    return x2d.reshape(B, L, C)


def patch_merging(x, p, H, W):
    B, L, C = x.shape
    x = x.reshape(B, H, W, C)
    x0 = x[:, 0::2, 0::2, :]
    x1 = x[:, 1::2, 0::2, :]
    x2 = x[:, 0::2, 1::2, :]
    x3 = x[:, 1::2, 1::2, :]
    x = jnp.concatenate([x0, x1, x2, x3], axis=-1)
    x = x.reshape(B * (H // 2) * (W // 2), 4 * C)
    # norm fused as prologue of the (bias-free) 4C -> 2C reduction.
    y = pallas_fused_linear(x, p['red_w'], None,
                            ln_in=(p['norm_g'], p['norm_b']),
                            out_dtype=jnp.float32)
    return y.reshape(B, (H // 2) * (W // 2), 2 * C)


def swin_encoder_forward(params, x, patch_size=4):
    """x: (B, Cin, H, W) NCHW, like the PyTorch module. Returns (B, L_out, C_out)."""
    x = patch_embed(x, params['patch_embed'], patch_size)
    # pos_drop: identity at inference
    for layer in params['layers']:
        H = W = layer['res']
        for blk in layer['blocks']:
            x = swin_block(x, blk['params'], H, W, blk['nh'], blk['ws'],
                           blk['shift'], blk['mask'])
        if 'downsample' in layer:
            x = patch_merging(x, layer['downsample'], H, W)
    return x


# --------------------------------------------------------------------------
# Deterministic synthetic parameter initialization
# --------------------------------------------------------------------------
# TODO(synk): on v7x the large qkv/fc1/fc2 weights could be fp8 (e4m3,
# per-channel scales) for ~2x MXU throughput; bf16 kept here for portability.

def init_params(key, *, in_chans, patch_size, embed_dim, depths, num_heads,
                window_size, img_size, mlp_ratio=4):
    keys = iter(jax.random.split(key, 512))

    def nrm(shape, std=0.02):
        return jax.random.normal(next(keys), shape, jnp.float32) * std

    def as_w(a):                       # matmul weights live in HBM as bf16
        return a.astype(jnp.bfloat16)

    params = {
        'patch_embed': {
            'proj_w': as_w(nrm((in_chans * patch_size * patch_size, embed_dim))),
            'proj_b': jnp.zeros((embed_dim,), jnp.float32),
            'norm_g': jnp.ones((embed_dim,), jnp.float32),
            'norm_b': jnp.zeros((embed_dim,), jnp.float32),
        },
        'layers': [],
    }

    dim = embed_dim
    for i, (depth, nh) in enumerate(zip(depths, num_heads)):
        res = img_size // patch_size // (2 ** i)
        ws = min(window_size, res)
        blocks = []
        for d in range(depth):
            shift = 0 if (d % 2 == 0 or res <= window_size) else window_size // 2
            table = nrm(((2 * ws - 1) ** 2, nh))

            # Fold the softmax scale into the q columns of the qkv projection
            # (mathematically identical to scaling q in attention; saves one
            # (Wb,N,N) multiply per head per step in the attention kernel).
            scale = float(dim // nh) ** -0.5
            qkv_w = nrm((dim, 3 * dim))
            qkv_w = qkv_w.at[:, :dim].multiply(scale)
            qkv_b = jnp.zeros((3 * dim,), jnp.float32)
            qkv_b = qkv_b.at[:dim].multiply(scale)

            blk = {
                'norm1_g': jnp.ones((dim,), jnp.float32),
                'norm1_b': jnp.zeros((dim,), jnp.float32),
                'qkv_w': as_w(qkv_w),
                'qkv_b': qkv_b,
                'rel_bias': make_rel_bias(table, ws, nh),
                'proj_w': as_w(nrm((dim, dim))),
                'proj_b': jnp.zeros((dim,), jnp.float32),
                'norm2_g': jnp.ones((dim,), jnp.float32),
                'norm2_b': jnp.zeros((dim,), jnp.float32),
                'fc1_w': as_w(nrm((dim, mlp_ratio * dim))),
                'fc1_b': jnp.zeros((mlp_ratio * dim,), jnp.float32),
                'fc2_w': as_w(nrm((mlp_ratio * dim, dim))),
                'fc2_b': jnp.zeros((dim,), jnp.float32),
            }
            blocks.append({'params': blk, 'shift': shift, 'ws': ws, 'nh': nh,
                           'mask': make_attn_mask(res, res, ws, shift)})
        layer = {'blocks': blocks, 'res': res, 'dim': dim}
        if i < len(depths) - 1:
            layer['downsample'] = {
                'norm_g': jnp.ones((4 * dim,), jnp.float32),
                'norm_b': jnp.zeros((4 * dim,), jnp.float32),
                'red_w': as_w(nrm((4 * dim, 2 * dim))),
            }
            dim *= 2
        params['layers'].append(layer)
    return params


# --------------------------------------------------------------------------
# Main
# --------------------------------------------------------------------------

if __name__ == "__main__":
    key = jax.random.PRNGKey(0)
    kp, kx = jax.random.split(key)

    # Small synthetic config (Swin-style: patch 4, window 4, depths [2,2], heads [2,4])
    B, Cin, H, W = 2, 3, 32, 32
    params = init_params(kp, in_chans=Cin, patch_size=4, embed_dim=32,
                         depths=[2, 2], num_heads=[2, 4],
                         window_size=4, img_size=H)

    x = jax.random.normal(kx, (B, Cin, H, W), jnp.float32)
    out = swin_encoder_forward(params, x)
    out = jax.block_until_ready(out)

    # After patch_embed (8x8 tokens, C=32), stage-0 (2 blocks) + patch merging
    # (4x4 tokens, C=64), stage-1 (2 blocks, no downsample):
    assert out.shape == (B, 16, 64), out.shape
    assert bool(jnp.all(jnp.isfinite(out)))
    print("KERNEL_OK")
</pallas_src>

<mosaic_0001>
module attributes {stable_mosaic.version = 11 : i64} {
  func.func @kernel(%arg0: i32, %arg1: i32, %arg2: memref<128x48xf32, #tpu.memory_space<vmem>>, %arg3: memref<48x32xbf16, #tpu.memory_space<vmem>>, %arg4: memref<1x32xf32, #tpu.memory_space<vmem>>, %arg5: memref<1x32xf32, #tpu.memory_space<vmem>>, %arg6: memref<1x32xf32, #tpu.memory_space<vmem>>, %arg7: memref<128x32xf32, #tpu.memory_space<vmem>>) attributes {dimension_semantics = [#tpu.dimension_semantics<parallel>, #tpu.dimension_semantics<parallel>], iteration_bounds = array<i64: 1, 1>, scalar_prefetch = 0 : i64, scratch_operands = 0 : i64, tpu.core_type = #tpu.core_type<tc>, window_params = [{transform_indices = @transform_0, window_bounds = array<i64: 128, 48>}, {transform_indices = @transform_1, window_bounds = array<i64: 48, 32>}, {transform_indices = @transform_2, window_bounds = array<i64: 1, 32>}, {transform_indices = @transform_3, window_bounds = array<i64: 1, 32>}, {transform_indices = @transform_4, window_bounds = array<i64: 1, 32>}, {transform_indices = @transform_5, window_bounds = array<i64: 128, 32>}]} {
    %c0 = arith.constant 0 : index
    %c0_0 = arith.constant 0 : index
    %0 = vector.load %arg2[%c0, %c0_0] : memref<128x48xf32, #tpu.memory_space<vmem>>, vector<128x48xf32>
    %1 = arith.truncf %0 : vector<128x48xf32> to vector<128x48xbf16>
    %c0_1 = arith.constant 0 : index
    %c0_2 = arith.constant 0 : index
    %2 = vector.load %arg3[%c0_1, %c0_2] : memref<48x32xbf16, #tpu.memory_space<vmem>>, vector<48x32xbf16>
    %cst = arith.constant dense<0.000000e+00> : vector<128x32xf32>
    %3 = tpu.matmul %1, %2, %cst {dimension_numbers = #tpu.dot_dimension_numbers<[1], [0], [0], [1], [0, 0, 1, 1], [], []>} : vector<128x48xbf16>, vector<48x32xbf16>, vector<128x32xf32> -> vector<128x32xf32>
    %c0_3 = arith.constant 0 : index
    %c0_4 = arith.constant 0 : index
    %4 = vector.load %arg4[%c0_3, %c0_4] : memref<1x32xf32, #tpu.memory_space<vmem>>, vector<1x32xf32>
    %5 = vector.broadcast %4 : vector<1x32xf32> to vector<128x32xf32>
    %6 = arith.addf %3, %5 : vector<128x32xf32>
    %cst_5 = arith.constant dense<0.000000e+00> : vector<128xf32>
    %7 = vector.multi_reduction <add>, %6, %cst_5 [1] : vector<128x32xf32> to vector<128xf32>
    %8 = vector.shape_cast %7 : vector<128xf32> to vector<128x1xf32>
    %cst_6 = arith.constant 3.200000e+01 : f32
    %9 = vector.broadcast %cst_6 : f32 to vector<128x1xf32>
    %10 = arith.divf %8, %9 : vector<128x1xf32>
    %11 = vector.broadcast %10 : vector<128x1xf32> to vector<128x32xf32>
    %12 = arith.subf %6, %11 : vector<128x32xf32>
    %13 = arith.mulf %12, %12 : vector<128x32xf32>
    %cst_7 = arith.constant dense<0.000000e+00> : vector<128xf32>
    %14 = vector.multi_reduction <add>, %13, %cst_7 [1] : vector<128x32xf32> to vector<128xf32>
    %15 = vector.shape_cast %14 : vector<128xf32> to vector<128x1xf32>
    %cst_8 = arith.constant 3.200000e+01 : f32
    %16 = vector.broadcast %cst_8 : f32 to vector<128x1xf32>
    %17 = arith.divf %15, %16 : vector<128x1xf32>
    %cst_9 = arith.constant 9.99999974E-6 : f32
    %18 = vector.broadcast %cst_9 : f32 to vector<128x1xf32>
    %19 = arith.addf %17, %18 : vector<128x1xf32>
    %20 = math.rsqrt %19 : vector<128x1xf32>
    %21 = vector.broadcast %20 : vector<128x1xf32> to vector<128x32xf32>
    %22 = arith.mulf %12, %21 : vector<128x32xf32>
    %c0_10 = arith.constant 0 : index
    %c0_11 = arith.constant 0 : index
    %23 = vector.load %arg5[%c0_10, %c0_11] : memref<1x32xf32, #tpu.memory_space<vmem>>, vector<1x32xf32>
    %24 = vector.broadcast %23 : vector<1x32xf32> to vector<128x32xf32>
    %25 = arith.mulf %22, %24 : vector<128x32xf32>
    %c0_12 = arith.constant 0 : index
    %c0_13 = arith.constant 0 : index
    %26 = vector.load %arg6[%c0_12, %c0_13] : memref<1x32xf32, #tpu.memory_space<vmem>>, vector<1x32xf32>
    %27 = vector.broadcast %26 : vector<1x32xf32> to vector<128x32xf32>
    %28 = arith.addf %25, %27 : vector<128x32xf32>
    %c0_14 = arith.constant 0 : index
    %c0_15 = arith.constant 0 : index
    %29 = vector.load %arg7[%c0_14, %c0_15] : memref<128x32xf32, #tpu.memory_space<vmem>>, vector<128x32xf32>
    tpu.vector_store %arg7[%c0_14, %c0_15], %28 {strides = array<i32>} : memref<128x32xf32, #tpu.memory_space<vmem>>, vector<128x32xf32>,
    return
  }
  func.func @transform_0(%arg0: i32, %arg1: i32) -> (i32, i32) {
    %c0_i32 = arith.constant 0 : i32
    %c0_i32_0 = arith.constant 0 : i32
    return %arg0, %c0_i32 : i32, i32
  }
  func.func @transform_1(%arg0: i32, %arg1: i32) -> (i32, i32) {
    %c0_i32 = arith.constant 0 : i32
    %c0_i32_0 = arith.constant 0 : i32
    return %c0_i32, %arg1 : i32, i32
  }
  func.func @transform_2(%arg0: i32, %arg1: i32) -> (i32, i32) {
    %c0_i32 = arith.constant 0 : i32
    %c0_i32_0 = arith.constant 0 : i32
    return %c0_i32, %arg1 : i32, i32
  }
  func.func @transform_3(%arg0: i32, %arg1: i32) -> (i32, i32) {
    %c0_i32 = arith.constant 0 : i32
    %c0_i32_0 = arith.constant 0 : i32
    return %c0_i32, %arg1 : i32, i32
  }
  func.func @transform_4(%arg0: i32, %arg1: i32) -> (i32, i32) {
    %c0_i32 = arith.constant 0 : i32
    %c0_i32_0 = arith.constant 0 : i32
    return %c0_i32, %arg1 : i32, i32
  }
  func.func @transform_5(%arg0: i32, %arg1: i32) -> (i32, i32) {
    %c0_i32 = arith.constant 0 : i32
    return %arg0, %arg1 : i32, i32
  }
}

</mosaic_0001>

<bundles_post_ra>
// kernel: tpu_custom_call.1
= control target key start
LH: loop header
LB: loop body
LE: loop exit
PB: predicated region body
PF: predicated region fallthrough
CT: control target
= control target key end

     0   :  { %vm76_vm0 = vcmask 392192   ;;  %vm198_vm1 = vcmask 261120   ;;  %s938_s1 = inlined_call_operand.vmem [shape: bf16[48,32], index: 1, kind: input, shape index: {}]   ;;  %s939_s0 = inlined_call_operand.vmem [shape: f32[128,48], index: 0, kind: input, shape index: {}]   ;;  %s940_s2 = inlined_call_operand.vmem [shape: f32[1,32], index: 2, kind: input, shape index: {}]   ;;  %s941_s3 = inlined_call_operand.vmem [shape: f32[1,32], index: 3, kind: input, shape index: {}]   ;;  %s942_s4 = inlined_call_operand.vmem [shape: f32[1,32], index: 4, kind: input, shape index: {}]   ;;  %s943_s5 = inlined_call_operand.vmem [shape: f32[128,32], index: 5, kind: output, shape index: {}]  }
   0x1   :  { %v527_v0 = vld [vmem:[%s938_s1 + $0x10] sm:$0xff]   ;;  %v528_v1 = vld [vmem:[%s938_s1 + $0x8] sm:$0xff]   ;;  %v21_v2 = vld [vmem:[%s939_s0] sm:$0xff] }
   0x2   :  { %499 = vmatprep.subr.bf16.mxu0 %v527_v0  ;;  %521 = vmatprep.subr.bf16.mxu1 %v527_v0  ;;  %v22_v3 = vld [vmem:[%s939_s0 + $0x8] sm:$0xff]  ;;  %v29_v4 = vld [vmem:[%s939_s0 + $0x40] sm:$0xff]  ;;  %v23_v9 = vld [vmem:[%s939_s0 + $0x10] sm:$0xff] }
   0x3   :  { %500 = vmatpush3.bf16.msra.mxu0 %v527_v0  ;;  %524 = vmatpush3.bf16.msra.mxu1 %v527_v0  ;;  %v529_v5 = vld [vmem:[%s938_s1] sm:$0xff]   ;;  %v37_v6 = vpack.c.bf16 %v22_v3, %v21_v2  ;;  %v30_v7 = vld [vmem:[%s939_s0 + $0x48] sm:$0xff]  ;;  %v24_v10 = vld [vmem:[%s939_s0 + $0x18] sm:$0xff] }
   0x4   :  { %501 = vmatprep.subr.bf16.mxu0 %v528_v1  ;;  %522 = vmatprep.subr.bf16.mxu1 %v528_v1  ;;  %v41_v8 = vpack.c.bf16 %v30_v7, %v29_v4  ;;  %v31_v11 = vld [vmem:[%s939_s0 + $0x50] sm:$0xff]  ;;  %v32_v12 = vld [vmem:[%s939_s0 + $0x58] sm:$0xff]  ;;  %v25_v13 = vld [vmem:[%s939_s0 + $0x20] sm:$0xff]  ;;  %v38_v17 = vpack.c.bf16 %v24_v10, %v23_v9 }
   0x5   :  { %505 = vmatprep.mubr.msk.bf16.mxu0 %vm76_vm0, %v37_v6  ;;  %v26_v14 = vld [vmem:[%s939_s0 + $0x28] sm:$0xff]  ;;  %v33_v15 = vld [vmem:[%s939_s0 + $0x60] sm:$0xff]  ;;  %v42_v18 = vpack.c.bf16 %v32_v12, %v31_v11  ;;  %v27_v21 = vld [vmem:[%s939_s0 + $0x30] sm:$0xff] }
   0x6   :  { %v34_v16 = vld [vmem:[%s939_s0 + $0x68] sm:$0xff]  ;;  %513 = vmatprep.mubr.msk.bf16.mxu1 %vm76_vm0, %v41_v8  ;;  %v39_v19 = vpack.c.bf16 %v26_v14, %v25_v13  ;;  %v28_v22 = vld [vmem:[%s939_s0 + $0x38] sm:$0xff]  ;;  %v35_v23 = vld [vmem:[%s939_s0 + $0x70] sm:$0xff] }
   0x7   :  { %502 = vmatpush3.bf16.msra.mxu0 %v528_v1  ;;  %525 = vmatpush3.bf16.msra.mxu1 %v528_v1  ;;  %v43_v20 = vpack.c.bf16 %v34_v16, %v33_v15  ;;  %v36_v24 = vld [vmem:[%s939_s0 + $0x78] sm:$0xff]  ;;  %v40_v25 = vpack.c.bf16 %v28_v22, %v27_v21  ;;  %v474_v27 = vld [vmem:[%s940_s2] ss:$0 sm:$0xff] }
   0x8   :  { %503 = vmatprep.subr.bf16.mxu0 %v529_v5  ;;  %523 = vmatprep.subr.bf16.mxu1 %v529_v5  ;;  %v44_v26 = vpack.c.bf16 %v36_v24, %v35_v23 }
   0xb   :  { %504 = vmatpush3.bf16.msra.mxu0 %v529_v5  ;;  %526 = vmatpush3.bf16.msra.mxu1 %v529_v5 }
   0xe   :  { %506 = vmatmul.mubr.msk.bf16.vlgmr.msra.gmra.mxu0 %vm76_vm0, %v38_v17  ;;  %514 = vmatmul.mubr.msk.bf16.vlgmr.msra.gmra.mxu1 %vm76_vm0, %v42_v18 }
   0xf   :  { %509 = vmatprep.mubr.msk.bf16.mxu0 %vm76_vm0, %v39_v19  ;;  %517 = vmatprep.mubr.msk.bf16.mxu1 %vm76_vm0, %v43_v20 }
  0x16   :  { %510 = vmatmul.mubr.msk.bf16.gmra.mxu0 %vm76_vm0, %v40_v25  ;;  %518 = vmatmul.mubr.msk.bf16.gmra.mxu1 %vm76_vm0, %v44_v26 }
  0xce   :  { %v507_v28 = vpop.f32.mrf.mxu0  ;;  %v515_v29 = vpop.f32.mrf.mxu1 }
  0xcf   :  { %v660_v30 = vadd.f32 %v507_v28, %v474_v27  ;;  %v662_v31 = vadd.f32 %v515_v29, %v474_v27 }
  0xd0   :  { %v135_v32 = vpop.f32.mrf.mxu0  ;;  %v167_v33 = vpop.f32.mrf.mxu1 }
  0xd1   :  { %v664_v34 = vadd.f32 %v474_v27, %v135_v32  ;;  %v229_v35 = vsel %vm198_vm1, %v662_v31, 0.0  ;;  %v205_v36 = vsel %vm198_vm1, %v660_v30, 0.0  ;;  %v670_v42 = vadd.f32 %v474_v27, %v167_v33 }
  0xd2   :  { %230 = vadd.xlane.f32.xlu0 %v229_v35  ;;  %v516_v37 = vpop.f32.mrf.mxu1  ;;  %206 = vadd.xlane.f32.xlu1 %v205_v36  ;;  %v508_v38 = vpop.f32.mrf.mxu0 }
  0xd3   :  { %v147_v39 = vadd.f32 %v508_v38, %v474_v27  ;;  %v672_v43 = vadd.f32 %v516_v37, %v474_v27  ;;  %v199_v45 = vsel %vm198_vm1, %v664_v34, 0.0  ;;  %v223_v52 = vsel %vm198_vm1, %v670_v42, 0.0 }
  0xd4   :  { %v138_v40 = vpop.f32.mrf.mxu0  ;;  %v170_v41 = vpop.f32.mrf.mxu1 }
  0xd5   :  { %v208_v44 = vsel %vm198_vm1, %v147_v39, 0.0  ;;  %v677_v49 = vadd.f32 %v474_v27, %v138_v40  ;;  %v679_v50 = vadd.f32 %v474_v27, %v170_v41  ;;  %v232_v51 = vsel %vm198_vm1, %v672_v43, 0.0 }
  0xd6   :  { %209 = vadd.xlane.f32.xlu1 %v208_v44  ;;  %200 = vadd.xlane.f32.xlu0 %v199_v45  ;;  %v511_v46 = vpop.f32.mrf.mxu0  ;;  %v519_v47 = vpop.f32.mrf.mxu1 }
  0xd7   :  { %v685_v55 = vadd.f32 %v511_v46, %v474_v27  ;;  %v226_v57 = vsel %vm198_vm1, %v679_v50, 0.0  ;;  %v202_v58 = vsel %vm198_vm1, %v677_v49, 0.0  ;;  %v709_v6 = vadd.f32 %v519_v47, %v474_v27 }
  0xd8   :  { %v151_v48 = vpop.f32.mrf.mxu0  ;;  %v183_v54 = vpop.f32.mrf.mxu1 }
  0xd9   :  { %v217_v62 = vsel %vm198_vm1, %v685_v55, 0.0  ;;  %v697_v63 = vadd.f32 %v474_v27, %v151_v48  ;;  %v701_v2 = vadd.f32 %v474_v27, %v183_v54  ;;  %v241_v11 = vsel %vm198_vm1, %v709_v6, 0.0 }
  0xda   :  { %233 = vadd.xlane.f32.xlu1 %v232_v51  ;;  %224 = vadd.xlane.f32.xlu0 %v223_v52  ;;  %v512_v53 = vpop.f32.mrf.mxu0  ;;  %v520_v60 = vpop.f32.mrf.mxu1 }
  0xdb   :  { %v687_v56 = vadd.f32 %v512_v53, %v474_v27  ;;  %v211_v5 = vsel %vm198_vm1, %v697_v63, 0.0  ;;  %v711_v7 = vadd.f32 %v520_v60, %v474_v27  ;;  %v235_v9 = vsel %vm198_vm1, %v701_v2, 0.0 }
  0xdc   :  { %v154_v59 = vpop.f32.mrf.mxu0  ;;  %v186_v1 = vpop.f32.mrf.mxu1 }
  0xdd   :  { %v220_v61 = vsel %vm198_vm1, %v687_v56, 0.0  ;;  %v699_v0 = vadd.f32 %v474_v27, %v154_v59  ;;  %v703_v3 = vadd.f32 %v474_v27, %v186_v1  ;;  %v244_v10 = vsel %vm198_vm1, %v711_v7, 0.0 }
  0xde   :  { %227 = vadd.xlane.f32.xlu1 %v226_v57  ;;  %203 = vadd.xlane.f32.xlu0 %v202_v58 }
  0xdf   :  { %v214_v4 = vsel %vm198_vm1, %v699_v0, 0.0  ;;  %v238_v8 = vsel %vm198_vm1, %v703_v3, 0.0 }
  0xe2   :  { %221 = vadd.xlane.f32.xlu1 %v220_v61  ;;  %218 = vadd.xlane.f32.xlu0 %v217_v62 }
  0xe6   :  { %215 = vadd.xlane.f32.xlu1 %v214_v4  ;;  %212 = vadd.xlane.f32.xlu0 %v211_v5 }
  0xea   :  { %239 = vadd.xlane.f32.xlu1 %v238_v8  ;;  %236 = vadd.xlane.f32.xlu0 %v235_v9 }
  0xee   :  { %245 = vadd.xlane.f32.xlu1 %v244_v10  ;;  %242 = vadd.xlane.f32.xlu0 %v241_v11 }
 0x15b   :  { %v231_v12 = vpop.xlane.xlu0 %230  ;;  %v207_v13 = vpop.xlane.xlu1 %206 }
 0x15c   :  { %v258_v14 = vmul.f32 0.03125, %v231_v12  ;;  %v250_v15 = vmul.f32 0.03125, %v207_v13 }
 0x15e   :  { %v722_v16 = vsub.f32 %v662_v31, %v258_v14  ;;  %v725_v17 = vsub.f32 %v660_v30, %v250_v15 }
 0x15f   :  { %v210_v18 = vpop.xlane.xlu1 %209  ;;  %v201_v19 = vpop.xlane.xlu0 %200 }
 0x160   :  { %v251_v20 = vmul.f32 0.03125, %v210_v18  ;;  %v248_v21 = vmul.f32 0.03125, %v201_v19  ;;  %v282_v22 = vmul.f32 %v725_v17, %v725_v17  ;;  %v290_v26 = vmul.f32 %v722_v16, %v722_v16 }
 0x162   :  { %v729_v23 = vsub.f32 %v147_v39, %v251_v20  ;;  %v732_v24 = vsub.f32 %v664_v34, %v248_v21  ;;  %v302_v25 = vsel %vm198_vm1, %v282_v22, 0.0  ;;  %v326_v36 = vsel %vm198_vm1, %v290_v26, 0.0 }
 0x163   :  { %v234_v27 = vpop.xlane.xlu1 %233  ;;  %303 = vadd.xlane.f32.xlu0 %v302_v25  ;;  %v225_v28 = vpop.xlane.xlu0 %224 }
 0x164   :  { %v259_v29 = vmul.f32 0.03125, %v234_v27  ;;  %v256_v30 = vmul.f32 0.03125, %v225_v28  ;;  %v283_v31 = vmul.f32 %v729_v23, %v729_v23  ;;  %v280_v32 = vmul.f32 %v732_v24, %v732_v24 }
 0x166   :  { %v742_v33 = vsub.f32 %v672_v43, %v259_v29  ;;  %v745_v34 = vsub.f32 %v670_v42, %v256_v30  ;;  %v305_v35 = vsel %vm198_vm1, %v283_v31, 0.0  ;;  %v296_v44 = vsel %vm198_vm1, %v280_v32, 0.0 }
 0x167   :  { %v228_v37 = vpop.xlane.xlu1 %227  ;;  %306 = vadd.xlane.f32.xlu1 %v305_v35  ;;  %327 = vadd.xlane.f32.xlu0 %v326_v36  ;;  %v204_v38 = vpop.xlane.xlu0 %203 }
 0x168   :  { %v257_v39 = vmul.f32 0.03125, %v228_v37  ;;  %v249_v40 = vmul.f32 0.03125, %v204_v38  ;;  %v291_v41 = vmul.f32 %v742_v33, %v742_v33  ;;  %v288_v46 = vmul.f32 %v745_v34, %v745_v34 }
 0x16a   :  { %v753_v43 = vsub.f32 %v679_v50, %v257_v39  ;;  %v756_v42 = vsub.f32 %v677_v49, %v249_v40  ;;  %v329_v45 = vsel %vm198_vm1, %v291_v41, 0.0  ;;  %v320_v57 = vsel %vm198_vm1, %v288_v46, 0.0 }
 0x16b   :  { %v222_v47 = vpop.xlane.xlu1 %221  ;;  %330 = vadd.xlane.f32.xlu1 %v329_v45  ;;  %297 = vadd.xlane.f32.xlu0 %v296_v44  ;;  %v219_v48 = vpop.xlane.xlu0 %218 }
 0x16c   :  { %v255_v51 = vmul.f32 0.03125, %v222_v47  ;;  %v254_v52 = vmul.f32 0.03125, %v219_v48  ;;  %v281_v53 = vmul.f32 %v756_v42, %v756_v42  ;;  %v289_v50 = vmul.f32 %v753_v43, %v753_v43 }
 0x16e   :  { %v766_v49 = vsub.f32 %v687_v56, %v255_v51  ;;  %v769_v54 = vsub.f32 %v685_v55, %v254_v52  ;;  %v299_v58 = vsel %vm198_vm1, %v281_v53, 0.0  ;;  %v323_v4 = vsel %vm198_vm1, %v289_v50, 0.0 }
 0x16f   :  { %v216_v59 = vpop.xlane.xlu1 %215  ;;  %321 = vadd.xlane.f32.xlu0 %v320_v57  ;;  %300 = vadd.xlane.f32.xlu1 %v299_v58  ;;  %v213_v60 = vpop.xlane.xlu0 %212 }
 0x170   :  { %v253_v61 = vmul.f32 0.03125, %v216_v59  ;;  %v252_v62 = vmul.f32 0.03125, %v213_v60  ;;  %v286_v1 = vmul.f32 %v769_v54, %v769_v54  ;;  %v287_v8 = vmul.f32 %v766_v49, %v766_v49 }
 0x172   :  { %v777_v56 = vsub.f32 %v699_v0, %v253_v61  ;;  %v780_v55 = vsub.f32 %v697_v63, %v252_v62  ;;  %v314_v5 = vsel %vm198_vm1, %v286_v1, 0.0  ;;  %v317_v15 = vsel %vm198_vm1, %v287_v8, 0.0  ;;  %v819_v8 = vld [vmem:[%s941_s3] ss:$0 sm:$0xff] }
 0x173   :  { %v240_v9 = vpop.xlane.xlu1 %239  ;;  %324 = vadd.xlane.f32.xlu1 %v323_v4  ;;  %315 = vadd.xlane.f32.xlu0 %v314_v5  ;;  %v237_v10 = vpop.xlane.xlu0 %236 }
 0x174   :  { %v261_v11 = vmul.f32 0.03125, %v240_v9  ;;  %v260_v12 = vmul.f32 0.03125, %v237_v10  ;;  %v284_v13 = vmul.f32 %v780_v55, %v780_v55  ;;  %v285_v0 = vmul.f32 %v777_v56, %v777_v56 }
 0x176   :  { %v790_v63 = vsub.f32 %v703_v3, %v261_v11  ;;  %v793_v14 = vsub.f32 %v701_v2, %v260_v12  ;;  %v308_v18 = vsel %vm198_vm1, %v284_v13, 0.0  ;;  %v311_v26 = vsel %vm198_vm1, %v285_v0, 0.0  ;;  %v825_v12 = vld [vmem:[%s942_s4] ss:$0 sm:$0xff] }
 0x177   :  { %v246_v19 = vpop.xlane.xlu1 %245  ;;  %318 = vadd.xlane.f32.xlu1 %v317_v15  ;;  %309 = vadd.xlane.f32.xlu0 %v308_v18  ;;  %v243_v20 = vpop.xlane.xlu0 %242 }
 0x178   :  { %v263_v21 = vmul.f32 0.03125, %v246_v19  ;;  %v262_v22 = vmul.f32 0.03125, %v243_v20  ;;  %v292_v25 = vmul.f32 %v793_v14, %v793_v14  ;;  %v293_v28 = vmul.f32 %v790_v63, %v790_v63 }
 0x17a   :  { %v801_v3 = vsub.f32 %v711_v7, %v263_v21  ;;  %v804_v2 = vsub.f32 %v709_v6, %v262_v22  ;;  %v332_v27 = vsel %vm198_vm1, %v292_v25, 0.0  ;;  %v335_v30 = vsel %vm198_vm1, %v293_v28, 0.0 }
 0x17b   :  { %312 = vadd.xlane.f32.xlu1 %v311_v26  ;;  %333 = vadd.xlane.f32.xlu0 %v332_v27 }
 0x17c   :  { %v294_v29 = vmul.f32 %v804_v2, %v804_v2  ;;  %v295_v7 = vmul.f32 %v801_v3, %v801_v3 }
 0x17e   :  { %v338_v31 = vsel %vm198_vm1, %v294_v29, 0.0  ;;  %v341_v6 = vsel %vm198_vm1, %v295_v7, 0.0 }
 0x17f   :  { %336 = vadd.xlane.f32.xlu1 %v335_v30  ;;  %339 = vadd.xlane.f32.xlu0 %v338_v31 }
 0x183   :  { %342 = vadd.xlane.f32.xlu1 %v341_v6 }
 0x1ec   :  { %v304_v32 = vpop.xlane.xlu0 %303 }
 0x1ed   :  { %v346_v35 = vmul.f32 0.03125, %v304_v32 }
 0x1ef   :  { %v362_v36 = vadd.f32 1e-05, %v346_v35 }
 0x1f0   :  { %v307_v37 = vpop.xlane.xlu1 %306  ;;  %v328_v38 = vpop.xlane.xlu0 %327 }
 0x1f1   :  { %530 = vrsqrt.f32 %v362_v36  ;;  %v347_v39 = vmul.f32 0.03125, %v307_v37  ;;  %v354_v40 = vmul.f32 0.03125, %v328_v38 }
 0x1f3   :  { %v363_v41 = vadd.f32 1e-05, %v347_v39  ;;  %v370_v44 = vadd.f32 1e-05, %v354_v40 }
 0x1f4   :  { %v331_v45 = vpop.xlane.xlu1 %330  ;;  %v298_v46 = vpop.xlane.xlu0 %297 }
 0x1f5   :  { %532 = vrsqrt.f32 %v363_v41  ;;  %v355_v47 = vmul.f32 0.03125, %v331_v45  ;;  %v344_v48 = vmul.f32 0.03125, %v298_v46 }
 0x1f6   :  { %534 = vrsqrt.f32 %v370_v44 }
 0x1f7   :  { %v371_v51 = vadd.f32 1e-05, %v355_v47  ;;  %v360_v52 = vadd.f32 1e-05, %v344_v48 }
 0x1f8   :  { %v301_v53 = vpop.xlane.xlu1 %300  ;;  %v322_v50 = vpop.xlane.xlu0 %321 }
 0x1f9   :  { %536 = vrsqrt.f32 %v371_v51  ;;  %v345_v57 = vmul.f32 0.03125, %v301_v53  ;;  %v352_v58 = vmul.f32 0.03125, %v322_v50 }
 0x1fa   :  { %538 = vrsqrt.f32 %v360_v52 }
 0x1fb   :  { %v361_v59 = vadd.f32 1e-05, %v345_v57  ;;  %v368_v60 = vadd.f32 1e-05, %v352_v58 }
 0x1fc   :  { %v325_v61 = vpop.xlane.xlu1 %324  ;;  %v316_v62 = vpop.xlane.xlu0 %315 }
 0x1fd   :  { %540 = vrsqrt.f32 %v361_v59  ;;  %v353_v1 = vmul.f32 0.03125, %v325_v61  ;;  %v350_v4 = vmul.f32 0.03125, %v316_v62 }
 0x1fe   :  { %v531_v5 = vpop.eup %530  ;;  %542 = vrsqrt.f32 %v368_v60 }
 0x1ff   :  { %v394_v9 = vmul.f32 %v531_v5, %v725_v17  ;;  %v369_v10 = vadd.f32 1e-05, %v353_v1  ;;  %v366_v11 = vadd.f32 1e-05, %v350_v4 }
 0x200   :  { %v319_v13 = vpop.xlane.xlu1 %318  ;;  %v310_v0 = vpop.xlane.xlu0 %309 }
 0x201   :  { %v417_v15 = vmul.f32 %v819_v8, %v394_v9  ;;  %544 = vrsqrt.f32 %v369_v10  ;;  %v351_v18 = vmul.f32 0.03125, %v319_v13  ;;  %v348_v19 = vmul.f32 0.03125, %v310_v0 }
 0x202   :  { %v533_v20 = vpop.eup %532  ;;  %546 = vrsqrt.f32 %v366_v11 }
 0x203   :  { %v535_v21 = vpop.eup %534  ;;  %v440_v22 = vadd.f32 %v825_v12, %v417_v15  ;;  %v395_v17 = vmul.f32 %v533_v20, %v729_v23  ;;  %v367_v25 = vadd.f32 1e-05, %v351_v18  ;;  %v364_v26 = vadd.f32 1e-05, %v348_v19 }
 0x204   :  { %v402_v27 = vmul.f32 %v535_v21, %v722_v16  ;;  %v313_v28 = vpop.xlane.xlu1 %312  ;;  %v334_v29 = vpop.xlane.xlu0 %333 }
 0x205   :  { %456 = vst.msk [vmem:[%s943_s5 + $0x10] sm:$0xff] %vm198_vm1, %v440_v22  ;;  %v418_v30 = vmul.f32 %v819_v8, %v395_v17  ;;  %548 = vrsqrt.f32 %v367_v25  ;;  %v349_v31 = vmul.f32 0.03125, %v313_v28  ;;  %v356_v7 = vmul.f32 0.03125, %v334_v29 }
 0x206   :  { %v537_v6 = vpop.eup %536  ;;  %v425_v32 = vmul.f32 %v819_v8, %v402_v27  ;;  %550 = vrsqrt.f32 %v364_v26 }
 0x207   :  { %v539_v23 = vpop.eup %538  ;;  %v441_v35 = vadd.f32 %v825_v12, %v418_v30  ;;  %v403_v16 = vmul.f32 %v537_v6, %v742_v33  ;;  %v365_v36 = vadd.f32 1e-05, %v349_v31  ;;  %v372_v37 = vadd.f32 1e-05, %v356_v7 }
 0x208   :  { %v448_v38 = vadd.f32 %v825_v12, %v425_v32  ;;  %v392_v39 = vmul.f32 %v539_v23, %v732_v24  ;;  %v337_v40 = vpop.xlane.xlu1 %336  ;;  %v340_v41 = vpop.xlane.xlu0 %339 }
 0x209   :  { %457 = vst.msk [vmem:[%s943_s5 + $0x18] sm:$0xff] %vm198_vm1, %v441_v35  ;;  %v426_v44 = vmul.f32 %v819_v8, %v403_v16  ;;  %552 = vrsqrt.f32 %v365_v36  ;;  %v357_v45 = vmul.f32 0.03125, %v337_v40  ;;  %v358_v46 = vmul.f32 0.03125, %v340_v41 }
 0x20a   :  { %v541_v47 = vpop.eup %540  ;;  %464 = vst.msk [vmem:[%s943_s5 + $0x50] sm:$0xff] %vm198_vm1, %v448_v38  ;;  %v415_v24 = vmul.f32 %v819_v8, %v392_v39  ;;  %554 = vrsqrt.f32 %v372_v37 }
 0x20b   :  { %v543_v33 = vpop.eup %542  ;;  %v449_v48 = vadd.f32 %v825_v12, %v426_v44  ;;  %v393_v51 = vmul.f32 %v541_v47, %v756_v42  ;;  %v373_v52 = vadd.f32 1e-05, %v357_v45  ;;  %v374_v53 = vadd.f32 1e-05, %v358_v46 }
 0x20c   :  { %v438_v50 = vadd.f32 %v825_v12, %v415_v24  ;;  %v400_v57 = vmul.f32 %v543_v33, %v745_v34  ;;  %v343_v58 = vpop.xlane.xlu1 %342 }
 0x20d   :  { %465 = vst.msk [vmem:[%s943_s5 + $0x58] sm:$0xff] %vm198_vm1, %v449_v48  ;;  %v416_v59 = vmul.f32 %v819_v8, %v393_v51  ;;  %556 = vrsqrt.f32 %v373_v52  ;;  %v359_v60 = vmul.f32 0.03125, %v343_v58 }
 0x20e   :  { %v545_v61 = vpop.eup %544  ;;  %454 = vst.msk [vmem:[%s943_s5] sm:$0xff] %vm198_vm1, %v438_v50  ;;  %v423_v42 = vmul.f32 %v819_v8, %v400_v57  ;;  %558 = vrsqrt.f32 %v374_v53 }
 0x20f   :  { %v547_v34 = vpop.eup %546  ;;  %v439_v62 = vadd.f32 %v825_v12, %v416_v59  ;;  %v401_v1 = vmul.f32 %v545_v61, %v753_v43  ;;  %v375_v4 = vadd.f32 1e-05, %v359_v60 }
 0x210   :  { %v446_v5 = vadd.f32 %v825_v12, %v423_v42  ;;  %v398_v9 = vmul.f32 %v547_v34, %v769_v54 }
 0x211   :  { %455 = vst.msk [vmem:[%s943_s5 + $0x8] sm:$0xff] %vm198_vm1, %v439_v62  ;;  %v424_v10 = vmul.f32 %v819_v8, %v401_v1  ;;  %560 = vrsqrt.f32 %v375_v4 }
 0x212   :  { %v549_v11 = vpop.eup %548  ;;  %462 = vst.msk [vmem:[%s943_s5 + $0x40] sm:$0xff] %vm198_vm1, %v446_v5  ;;  %v421_v43 = vmul.f32 %v819_v8, %v398_v9 }
 0x213   :  { %v551_v13 = vpop.eup %550  ;;  %v447_v0 = vadd.f32 %v825_v12, %v424_v10  ;;  %v399_v54 = vmul.f32 %v549_v11, %v766_v49 }
 0x214   :  { %v444_v15 = vadd.f32 %v825_v12, %v421_v43  ;;  %v396_v18 = vmul.f32 %v551_v13, %v780_v55 }
 0x215   :  { %463 = vst.msk [vmem:[%s943_s5 + $0x48] sm:$0xff] %vm198_vm1, %v447_v0  ;;  %v422_v19 = vmul.f32 %v819_v8, %v399_v54 }
 0x216   :  { %v553_v20 = vpop.eup %552  ;;  %460 = vst.msk [vmem:[%s943_s5 + $0x30] sm:$0xff] %vm198_vm1, %v444_v15  ;;  %v419_v21 = vmul.f32 %v819_v8, %v396_v18 }
 0x217   :  { %v555_v49 = vpop.eup %554  ;;  %v445_v22 = vadd.f32 %v825_v12, %v422_v19  ;;  %v397_v55 = vmul.f32 %v553_v20, %v777_v56 }
 0x218   :  { %v442_v17 = vadd.f32 %v825_v12, %v419_v21  ;;  %v404_v25 = vmul.f32 %v555_v49, %v793_v14 }
 0x219   :  { %461 = vst.msk [vmem:[%s943_s5 + $0x38] sm:$0xff] %vm198_vm1, %v445_v22  ;;  %v420_v26 = vmul.f32 %v819_v8, %v397_v55 }
 0x21a   :  { %v557_v27 = vpop.eup %556  ;;  %458 = vst.msk [vmem:[%s943_s5 + $0x20] sm:$0xff] %vm198_vm1, %v442_v17  ;;  %v427_v28 = vmul.f32 %v819_v8, %v404_v25 }
 0x21b   :  { %v559_v56 = vpop.eup %558  ;;  %v443_v29 = vadd.f32 %v825_v12, %v420_v26  ;;  %v405_v14 = vmul.f32 %v557_v27, %v790_v63 }
 0x21c   :  { %v450_v30 = vadd.f32 %v825_v12, %v427_v28  ;;  %v406_v31 = vmul.f32 %v559_v56, %v804_v2 }
 0x21d   :  { %459 = vst.msk [vmem:[%s943_s5 + $0x28] sm:$0xff] %vm198_vm1, %v443_v29  ;;  %v428_v7 = vmul.f32 %v819_v8, %v405_v14 }
 0x21e   :  { %v561_v6 = vpop.eup %560  ;;  %466 = vst.msk [vmem:[%s943_s5 + $0x60] sm:$0xff] %vm198_vm1, %v450_v30  ;;  %v429_v32 = vmul.f32 %v819_v8, %v406_v31 }
 0x21f   :  { %v451_v63 = vadd.f32 %v825_v12, %v428_v7  ;;  %v407_v23 = vmul.f32 %v561_v6, %v801_v3 }
 0x220   :  { %v452_v2 = vadd.f32 %v825_v12, %v429_v32 }
 0x221   :  { %467 = vst.msk [vmem:[%s943_s5 + $0x68] sm:$0xff] %vm198_vm1, %v451_v63  ;;  %v430_v35 = vmul.f32 %v819_v8, %v407_v23 }
 0x222   :  { %468 = vst.msk [vmem:[%s943_s5 + $0x70] sm:$0xff] %vm198_vm1, %v452_v2 }
 0x223   :  { %v453_v16 = vadd.f32 %v825_v12, %v430_v35 }
 0x225   :  { %469 = vst.msk [vmem:[%s943_s5 + $0x78] sm:$0xff] %vm198_vm1, %v453_v16 }

</bundles_post_ra>
